<compile_context>
chip_gen: v5e
topology: v5e:2x2
jax: 0.10.0
libtpu: 0.0.40
codegen_flags: <defaults>
</compile_context>

<pallas_src>
import math

import jax
import jax.numpy as jnp
from jax.experimental import pallas as pl
from jax.experimental.pallas import tpu as pltpu

_TARGET_BLOCK_BYTES = 2 * 1024 * 1024  # ~2 MiB blocks: large DMAs, VMEM-safe


def _copy_kernel(x_ref, o_ref):
    # Lane-dense (TR, TC) tile -> identical (TR, TC) tile: unmasked vst copy.
    o_ref[...] = x_ref[...]


def _pick_lane_tile(c: int, itemsize: int) -> int:
    """Largest multiple of 128 that divides `c`, capped near the block target.

    Falls back to the full extent when `c` is not a multiple of 128 (tail
    stores become masked — perf only, never a correctness issue).
    """
    if c % 128 != 0:
        return c
    max_tc = max(128, _TARGET_BLOCK_BYTES // (8 * itemsize))
    best = 128
    t = 128
    limit = min(c, max_tc)
    while t <= limit:
        if c % t == 0:
            best = t
        t += 128
    return best


def _pick_row_tile(r: int, tc: int, itemsize: int) -> int:
    """Rows per block so TR*TC*itemsize ~ target; multiple of 8 or full R."""
    rows = max(1, _TARGET_BLOCK_BYTES // max(1, tc * itemsize))
    if rows >= r:
        return r
    rows = (rows // 8) * 8
    if rows < 8:
        rows = 8
    return r if rows >= r else rows


def _tiled_copy_2d(x2: jax.Array) -> jax.Array:
    """Tiled lane-dense copy of a 2D slab via pallas_call."""
    r, c = x2.shape
    itemsize = jnp.dtype(x2.dtype).itemsize
    tc = _pick_lane_tile(c, itemsize)
    tr = _pick_row_tile(r, tc, itemsize)
    grid = (pl.cdiv(r, tr), pl.cdiv(c, tc))

    return pl.pallas_call(
        _copy_kernel,
        out_shape=jax.ShapeDtypeStruct((r, c), x2.dtype),
        grid_spec=pltpu.PrefetchScalarGridSpec(
            num_scalar_prefetch=0,
            grid=grid,
            in_specs=[pl.BlockSpec((tr, tc), lambda i, j: (i, j))],
            out_specs=pl.BlockSpec((tr, tc), lambda i, j: (i, j)),
        ),
        compiler_params=pltpu.CompilerParams(
            dimension_semantics=("parallel", "parallel"),
        ),
    )(x2)


def flatten(x: jax.Array) -> jax.Array:
    """Pallas equivalent of Flatten.forward: (N, ...) -> (N, prod(...))."""
    n = x.shape[0]
    flat = math.prod(x.shape[1:])
    total = n * flat
    itemsize = jnp.dtype(x.dtype).itemsize

    if total % 128 == 0:
        # Re-view the full contiguous buffer as a maximally lane-dense slab
        # (free), so every store is a full-lane unmasked vst even when `flat`
        # itself is not a multiple of 128.
        c = _pick_lane_tile(total, itemsize)
        r = total // c
        y = _tiled_copy_2d(jnp.reshape(x, (r, c)))
    else:
        # Tiny/odd case: copy the (N, flat) view directly; last-dim stores may
        # be masked but correctness is unaffected.
        y = _tiled_copy_2d(jnp.reshape(x, (n, flat)))

    return jnp.reshape(y, (n, flat))


if __name__ == "__main__":
    key = jax.random.PRNGKey(0)
    # Small NCHW input consistent with an MNIST-style feature map.
    x = jax.random.normal(key, (2, 4, 16, 16), dtype=jnp.float32)

    out = flatten(x)
    jax.block_until_ready(out)

    # Reference check against plain reshape (same semantics as torch .view).
    ref = x.reshape(x.shape[0], -1)
    assert out.shape == (2, 4 * 16 * 16), out.shape
    assert out.dtype == x.dtype
    assert bool(jnp.allclose(out, ref)), "mismatch vs reference flatten"

    print("KERNEL_OK")
</pallas_src>

<mosaic_0001>
module attributes {stable_mosaic.version = 11 : i64} {
  func.func @_copy_kernel(%arg0: i32, %arg1: i32, %arg2: memref<1x2048xf32, #tpu.memory_space<vmem>>, %arg3: memref<1x2048xf32, #tpu.memory_space<vmem>>) attributes {dimension_semantics = [#tpu.dimension_semantics<parallel>, #tpu.dimension_semantics<parallel>], iteration_bounds = array<i64: 1, 1>, scalar_prefetch = 0 : i64, scratch_operands = 0 : i64, tpu.core_type = #tpu.core_type<tc>, window_params = [{transform_indices = @transform_0, window_bounds = array<i64: 1, 2048>}, {transform_indices = @transform_1, window_bounds = array<i64: 1, 2048>}]} {
    %c0 = arith.constant 0 : index
    %c0_0 = arith.constant 0 : index
    %0 = vector.load %arg2[%c0, %c0_0] : memref<1x2048xf32, #tpu.memory_space<vmem>>, vector<1x2048xf32>
    %c0_1 = arith.constant 0 : index
    %c0_2 = arith.constant 0 : index
    %1 = vector.load %arg3[%c0_1, %c0_2] : memref<1x2048xf32, #tpu.memory_space<vmem>>, vector<1x2048xf32>
    tpu.vector_store %arg3[%c0_1, %c0_2], %0 {strides = array<i32>} : memref<1x2048xf32, #tpu.memory_space<vmem>>, vector<1x2048xf32>,
    return
  }
  func.func @transform_0(%arg0: i32, %arg1: i32) -> (i32, i32) {
    %c0_i32 = arith.constant 0 : i32
    return %arg0, %arg1 : i32, i32
  }
  func.func @transform_1(%arg0: i32, %arg1: i32) -> (i32, i32) {
    %c0_i32 = arith.constant 0 : i32
    return %arg0, %arg1 : i32, i32
  }
}

</mosaic_0001>

<bundles_post_ra>
// kernel: tpu_custom_call.1
= control target key start
LH: loop header
LB: loop body
LE: loop exit
PB: predicated region body
PF: predicated region fallthrough
CT: control target
= control target key end

     0   :  { %6 = vsyncpa [#allocation3], 0  ;;  %s116_s0 = inlined_call_operand.hbm [shape: f32[1,2048], index: 0, kind: input, shape index: {}]   ;;  %s117_s1 = inlined_call_operand.hbm [shape: f32[1,2048], index: 1, kind: output, shape index: {}]  }
   0x1   :  { %7 = vsyncpa [#allocation4], 0  ;;  %s13_s8 = sshll.u32 %s116_s0, 4  ;;  %s98_s9 = smov [#allocation2]   ;;  %s14_s8 = int_to_ptr.hbm [resolvable:$true] %s13_s8 }
   0x2   :  { %s15_s10 = sshll.u32 %s98_s9, 4  ;;  %s16_s10 = int_to_ptr.vmem [resolvable:$true] %s15_s10 }
   0x3   :  { %18 = dma.hbm_to_vmem [thread:$0]  %s14_s8, 256, %s16_s10, [#allocation3]  }
   0x4   :  { %94 = dma.done.wait [#allocation3], 256  }
   0x5   :  { %95 = vsyncadd [#allocation3], 4294967040  ;;  %s99_s11 = smov [#allocation5]   ;;  %s34_s15 = sshll.u32 %s117_s1, 4  ;;  %v23_v0 = vld [vmem:[#allocation2] sm:$0xff]  ;;  %v24_v1 = vld [vmem:[#allocation2 + $0x8] sm:$0xff]  ;;  %s35_s15 = int_to_ptr.hbm [resolvable:$true] %s34_s15 }
   0x6   :  { %s32_s12 = sshll.u32 %s99_s11, 4  ;;  %25 = vst [vmem:[#allocation5] sm:$0xff] %v23_v0  ;;  %s33_s12 = int_to_ptr.vmem [resolvable:$true] %s32_s12 }
   0x7   :  { %26 = vst [vmem:[#allocation5 + $0x8] sm:$0xff] %v24_v1 }
   0x8   :  { %37 = dma.vmem_to_hbm [thread:$0]  %s33_s12, 256, %s35_s15, [#allocation4]  }
   0x9   :  { %96 = dma.done.wait [#allocation4], 256  }
   0xa   :  { %97 = vsyncadd [#allocation4], 4294967040 }
   0xb   :  { %42 = vsyncpa [#allocation3], 1 }
   0xc   :  { %43 = vsyncpa [#allocation4], 1 }

</bundles_post_ra>
